<compile_context>
chip_gen: v6e
topology: v6e:2x2x1
jax: 0.10.0
libtpu: 0.0.40
codegen_flags: <defaults>
</compile_context>

<pallas_src>
import jax
import jax.numpy as jnp
from jax.experimental import pallas as pl
from jax.experimental.pallas import tpu as pltpu


def frozen_bn_kernel(scale_ref, shift_ref, x_ref, o_ref):
    """scale/shift: (TR, 1) f32 VMEM; x/o: (TR, THW) VMEM."""
    x = x_ref[...].astype(jnp.float32)
    # Elementwise affine in f32, broadcast along lanes, cast back on store.
    o_ref[...] = (x * scale_ref[...] + shift_ref[...]).astype(o_ref.dtype)


def _choose_tiles(R, HW, itemsize, target_bytes=4 << 20):
    """Pick (TR, THW) so one x block is <= ~target_bytes.

    Constraints respected:
      * THW is a multiple of 128 dividing HW, or THW == HW (full extent).
      * TR is a multiple of 8 dividing R, or TR == R (full extent).
    """
    # Lane-axis tile: keep the full HW unless a single row already exceeds the
    # budget AND it can be split into multiple-of-128 pieces.  Otherwise keep
    # it whole (correctness first; masked stores accepted for odd HW).
    thw = HW
    if HW * itemsize > target_bytes and HW % 128 == 0:
        n128 = HW // 128
        thw = 128
        for k in range(n128, 0, -1):
            if n128 % k == 0 and k * 128 * itemsize <= target_bytes:
                thw = k * 128
                break

    # Row tile: largest legal divisor of R whose block fits the budget;
    # if nothing fits, fall back to the smallest legal divisor.
    row_bytes = thw * itemsize
    candidates = [d for d in range(1, R + 1)
                  if R % d == 0 and (d % 8 == 0 or d == R)]
    fitting = [d for d in candidates if d * row_bytes <= target_bytes]
    tr = max(fitting) if fitting else min(candidates)
    return tr, thw


def frozen_batch_norm_2d(x, weight, bias, running_mean, running_var, eps=1e-5):
    """x: (B, C, H, W); weight/bias/running_mean/running_var: (C,)."""
    B, C, H, W = x.shape
    HW = H * W
    R = B * C

    # --- per-channel scale/shift precomputed once (O(C) work / bytes) -------
    w = weight.astype(jnp.float32)
    b = bias.astype(jnp.float32)
    rm = running_mean.astype(jnp.float32)
    rv = running_var.astype(jnp.float32)
    scale_c = w * jax.lax.rsqrt(rv + eps)               # (C,)
    shift_c = b - rm * scale_c                          # (C,)

    # Per-row (B*C) columns; row index r = b*C + c, so tile over batch.
    scale = jnp.tile(scale_c, B).reshape(R, 1)          # (B*C, 1) f32, tiny
    shift = jnp.tile(shift_c, B).reshape(R, 1)          # (B*C, 1) f32, tiny

    # --- 2-D lane-dense layout ----------------------------------------------
    x2 = x.reshape(R, HW)

    TR, THW = _choose_tiles(R, HW, x.dtype.itemsize)
    grid = (R // TR, HW // THW)                         # rows outer, HW inner

    block_bytes = TR * THW * x.dtype.itemsize
    # in + out double-buffered, plus params and headroom.
    vmem_limit = max(32 << 20, 6 * block_bytes)

    param_spec = pl.BlockSpec((TR, 1), lambda ri, hi: (ri, 0))

    out2 = pl.pallas_call(
        frozen_bn_kernel,
        out_shape=jax.ShapeDtypeStruct((R, HW), x.dtype),
        grid_spec=pltpu.PrefetchScalarGridSpec(
            num_scalar_prefetch=0,
            grid=grid,
            in_specs=[
                param_spec,                                           # scale
                param_spec,                                           # shift
                pl.BlockSpec((TR, THW), lambda ri, hi: (ri, hi)),     # x
            ],
            out_specs=pl.BlockSpec((TR, THW), lambda ri, hi: (ri, hi)),
        ),
        compiler_params=pltpu.CompilerParams(
            # Purely elementwise per-row: both grid axes are independent.
            dimension_semantics=("parallel", "parallel"),
            vmem_limit_bytes=int(vmem_limit),
        ),
    )(scale, shift, x2)

    return out2.reshape(B, C, H, W)


def frozen_batch_norm_2d_reference(x, weight, bias, running_mean, running_var,
                                   eps=1e-5):
    """Plain-JAX reference matching the PyTorch forward."""
    w = weight.reshape(1, -1, 1, 1)
    b = bias.reshape(1, -1, 1, 1)
    rv = running_var.reshape(1, -1, 1, 1)
    rm = running_mean.reshape(1, -1, 1, 1)
    scale = w * jax.lax.rsqrt(rv + eps)
    shift = b - rm * scale
    return x * scale + shift


if __name__ == "__main__":
    B, C, H, W = 2, 4, 16, 16

    key = jax.random.PRNGKey(0)
    kx, kw, kb, km, kv = jax.random.split(key, 5)
    x = jax.random.normal(kx, (B, C, H, W), dtype=jnp.float32)
    weight = 1.0 + 0.1 * jax.random.normal(kw, (C,), dtype=jnp.float32)
    bias = 0.1 * jax.random.normal(kb, (C,), dtype=jnp.float32)
    running_mean = 0.2 * jax.random.normal(km, (C,), dtype=jnp.float32)
    running_var = 1.0 + jnp.abs(jax.random.normal(kv, (C,), dtype=jnp.float32))

    out = frozen_batch_norm_2d(x, weight, bias, running_mean, running_var)
    out = jax.block_until_ready(out)

    ref = frozen_batch_norm_2d_reference(x, weight, bias, running_mean,
                                         running_var)
    assert out.shape == (B, C, H, W), out.shape
    assert jnp.allclose(out, ref, rtol=1e-5, atol=1e-6), (
        float(jnp.max(jnp.abs(out - ref))))

    print("KERNEL_OK")
</pallas_src>

<mosaic_0001>
module attributes {stable_mosaic.version = 11 : i64} {
  func.func @frozen_bn_kernel(%arg0: i32, %arg1: i32, %arg2: memref<8x1xf32, #tpu.memory_space<vmem>>, %arg3: memref<8x1xf32, #tpu.memory_space<vmem>>, %arg4: memref<8x256xf32, #tpu.memory_space<vmem>>, %arg5: memref<8x256xf32, #tpu.memory_space<vmem>>) attributes {dimension_semantics = [#tpu.dimension_semantics<parallel>, #tpu.dimension_semantics<parallel>], iteration_bounds = array<i64: 1, 1>, scalar_prefetch = 0 : i64, scratch_operands = 0 : i64, tpu.core_type = #tpu.core_type<tc>, window_params = [{transform_indices = @transform_0, window_bounds = array<i64: 8, 1>}, {transform_indices = @transform_1, window_bounds = array<i64: 8, 1>}, {transform_indices = @transform_2, window_bounds = array<i64: 8, 256>}, {transform_indices = @transform_3, window_bounds = array<i64: 8, 256>}]} {
    %c0 = arith.constant 0 : index
    %c0_0 = arith.constant 0 : index
    %0 = vector.load %arg4[%c0, %c0_0] : memref<8x256xf32, #tpu.memory_space<vmem>>, vector<8x256xf32>
    %c0_1 = arith.constant 0 : index
    %c0_2 = arith.constant 0 : index
    %1 = vector.load %arg2[%c0_1, %c0_2] : memref<8x1xf32, #tpu.memory_space<vmem>>, vector<8x1xf32>
    %2 = vector.broadcast %1 : vector<8x1xf32> to vector<8x256xf32>
    %3 = arith.mulf %0, %2 : vector<8x256xf32>
    %c0_3 = arith.constant 0 : index
    %c0_4 = arith.constant 0 : index
    %4 = vector.load %arg3[%c0_3, %c0_4] : memref<8x1xf32, #tpu.memory_space<vmem>>, vector<8x1xf32>
    %5 = vector.broadcast %4 : vector<8x1xf32> to vector<8x256xf32>
    %6 = arith.addf %3, %5 : vector<8x256xf32>
    %c0_5 = arith.constant 0 : index
    %c0_6 = arith.constant 0 : index
    %7 = vector.load %arg5[%c0_5, %c0_6] : memref<8x256xf32, #tpu.memory_space<vmem>>, vector<8x256xf32>
    tpu.vector_store %arg5[%c0_5, %c0_6], %6 {strides = array<i32>} : memref<8x256xf32, #tpu.memory_space<vmem>>, vector<8x256xf32>,
    return
  }
  func.func @transform_0(%arg0: i32, %arg1: i32) -> (i32, i32) {
    %c0_i32 = arith.constant 0 : i32
    %c0_i32_0 = arith.constant 0 : i32
    return %arg0, %c0_i32 : i32, i32
  }
  func.func @transform_1(%arg0: i32, %arg1: i32) -> (i32, i32) {
    %c0_i32 = arith.constant 0 : i32
    %c0_i32_0 = arith.constant 0 : i32
    return %arg0, %c0_i32 : i32, i32
  }
  func.func @transform_2(%arg0: i32, %arg1: i32) -> (i32, i32) {
    %c0_i32 = arith.constant 0 : i32
    return %arg0, %arg1 : i32, i32
  }
  func.func @transform_3(%arg0: i32, %arg1: i32) -> (i32, i32) {
    %c0_i32 = arith.constant 0 : i32
    return %arg0, %arg1 : i32, i32
  }
}

</mosaic_0001>

<bundles_post_ra>
// kernel: tpu_custom_call.1
= control target key start
LH: loop header
LB: loop body
LE: loop exit
PB: predicated region body
PF: predicated region fallthrough
CT: control target
= control target key end

     0   :  { %v74_v1 = vmov 0   ;;  %s111_s0 = inlined_call_operand.vmem [shape: f32[8,1], index: 0, kind: input, shape index: {}]   ;;  %s112_s1 = inlined_call_operand.vmem [shape: f32[8,1], index: 1, kind: input, shape index: {}]   ;;  %s113_s2 = inlined_call_operand.vmem [shape: f32[8,256], index: 2, kind: input, shape index: {}]   ;;  %s114_s3 = inlined_call_operand.hbm [shape: f32[8,256], index: 3, kind: output, shape index: {}]  }
   0x1   :  { %v17_v0 = vld [vmem:[%s111_s0] sm:$0xff]  ;;  %51 = vset.pattern.permute.xlu0 %v74_v1 }
   0x2   :  { %8 = vsyncpa [#allocation3], 0  ;;  %20 = vperm.xlu0 %51, %v17_v0   ;;  %v25_v2 = vld [vmem:[%s112_s1] sm:$0xff]  ;;  %v16_v5 = vld [vmem:[%s113_s2 + $0x8] sm:$0xff]  ;;  %s75_s20 = smov [#allocation2]  }
   0x3   :  { %v15_v4 = vld [vmem:[%s113_s2] sm:$0xff]  ;;  %s41_s0 = sshll.u32 %s75_s20, 4  ;;  %s42_s0 = int_to_ptr.vmem [resolvable:$true] %s41_s0 }
   0x4   :  { %s52_s1 = scalar_lea.vmem %s42_s0, 256  ;;  %p57_p1 = scmp.lt.s32.totalorder %s42_s0, %s42_s0 }
   0x5   :  { %p53_p0 = scmp.ne.s32.totalorder %s42_s0, %s52_s1  ;;  %p58_p2 = scmp.lt.s32.totalorder %s52_s1, %s52_s1 }
   0x6   :  { %28 = vperm.xlu0 %51, %v25_v2  }
   0x7   :  { %p59_p3 = por %p58_p2, %p57_p1 }
   0x9   :  { %p60_p4 = pnand %p59_p3, %p53_p0 }
  0x7d   :  { %v21_v3 = vpop.permute.xlu0 %20 }
  0x7e   :  { %v23_v6 = vmul.f32 %v21_v3, %v15_v4  ;;  %v24_v7 = vmul.f32 %v21_v3, %v16_v5 }
  0x81   :  { %v29_v8 = vpop.permute.xlu0 %28 }
  0x82   :  { %v31_v9 = vadd.f32 %v29_v8, %v23_v6  ;;  %v32_v10 = vadd.f32 %v29_v8, %v24_v7 }
  0x84   :  { %33 = vst [vmem:[#allocation2] sm:$0xff] %v31_v9  ;;  %34 = vst [vmem:[#allocation2 + $0x8] sm:$0xff] %v32_v10 }
  0x85   :  { %63 = shalt.err (!%p60_p4)
}
  0x86   :  { %44 = dma.vmem_to_hbm [thread:$0]  %s42_s0, 256, %s114_s3, [#allocation3]  }
  0x87   :  { %72 = dma.done.wait [#allocation3], 256  }
  0x88   :  { %73 = vsyncadd [#allocation3], 4294967040 }
  0x89   :  { %48 = vsyncpa [#allocation3], 1 }

</bundles_post_ra>
